<compile_context>
chip_gen: v6e
topology: v6e:2x2x1
jax: 0.10.0
libtpu: 0.0.40
codegen_flags: <defaults>
</compile_context>

<pallas_src>
import jax
import jax.numpy as jnp
from jax import lax
from jax.experimental import pallas as pl
from jax.experimental.pallas import tpu as pltpu


def _attn_key_kernel(x_ref, wb1_ref, wb2_ref, o_ref):
    # x_ref:   (bchunk, Cin, HW)   NCHW-native: HW (=256) on the lane axis
    # wb1_ref: (Cin, Cin+1)        packed [conv1 weight | bias]
    # wb2_ref: (K,   Cin+1)        packed [conv2 weight | bias]
    # o_ref:   (1, K, bchunk)      pooled keys, written once (lane = bchunk)
    bchunk, cin, hw = x_ref.shape
    n = bchunk * hw

    # Split the packed [W | b] parameter slabs with static slices (zero-cost
    # views of already-resident VMEM data; fetched once across the grid).
    wb1 = wb1_ref[...]
    wb2 = wb2_ref[...]
    w1 = wb1[:, :cin]               # (Cin, Cin)
    b1 = wb1[:, cin:cin + 1]        # (Cin, 1)
    w2 = wb2[:, :cin]               # (K, Cin)
    b2 = wb2[:, cin:cin + 1]        # (K, 1)

    # Assemble X = (Cin, bchunk*HW) by lane-axis concatenation of the per-batch
    # (Cin, HW) slabs.  HW is a multiple of 128, so this is pure vreg copies,
    # and it lets each conv run as ONE MXU matmul for the whole block instead
    # of one small matmul per batch element (amortizes MXU fill/drain).
    if bchunk == 1:
        x_cat = x_ref[0]
    else:
        x_cat = jnp.concatenate([x_ref[b] for b in range(bchunk)], axis=1)

    # conv1 (1x1) + ReLU : (Cin, Cin) @ (Cin, N) ; bias broadcast done once.
    h = jnp.dot(w1, x_cat, preferred_element_type=jnp.float32) + b1
    h = jnp.maximum(h, 0.0)

    # conv2 (1x1) + ReLU : (K, Cin) @ (Cin, N)
    z = jnp.dot(w2, h, preferred_element_type=jnp.float32) + b2
    z = jnp.maximum(z, 0.0)                                   # (K, N)

    # AvgPool2d(16) over each full 16x16 map == per-batch mean over HW.
    # Implemented as one MXU matmul against a block-structured selector
    # P^T (bchunk, N): 1/HW inside batch b's HW columns, 0 elsewhere.
    # Built with iota + range compare (no integer division), laid out with
    # N on lanes so it occupies only a handful of vregs.  Keeps the pool on
    # the otherwise-idle MXU slot and lands a lane-oriented (K, bchunk) row.
    col_idx = lax.broadcasted_iota(jnp.int32, (bchunk, n), 1)
    row_lo = lax.broadcasted_iota(jnp.int32, (bchunk, n), 0) * hw
    pool_t = jnp.where((col_idx >= row_lo) & (col_idx < row_lo + hw),
                       jnp.float32(1.0 / hw), jnp.float32(0.0))
    pooled = lax.dot_general(
        z, pool_t,
        dimension_numbers=(((1,), (1,)), ((), ())),
        preferred_element_type=jnp.float32)                   # (K, bchunk)

    o_ref[0] = pooled                                         # single store


def _pick_bchunk(batch):
    # Small batches (the launch/DMA-latency-bound regime): one grid step, one
    # x DMA, weights fetched once.  Larger batches: keep a batch grid so
    # BlockSpec double-buffering overlaps DMA with compute, with the in-kernel
    # lane-concat unroll capped at 8 slabs to bound program size.  Megacore
    # sharding on v7x then comes from the "parallel" grid axis automatically.
    max_unroll = 8
    if batch <= max_unroll:
        return batch
    for c in range(max_unroll, 0, -1):
        if batch % c == 0:
            return c
    return 1


def _forward(x_nchw, w1, b1, w2, b2):
    """x_nchw: (B, h_dim, H, W) f32; w1: (h_dim, h_dim); b1: (h_dim,);
    w2: (key, h_dim); b2: (key,).  Returns (B, key, 1, 1)."""
    B, Cin, H, W = x_nchw.shape
    # The module hard-codes AvgPool2d(16); on its 16x16 maps that is a full
    # spatial mean producing a 1x1 output.
    # TODO(synk): other spatial sizes (pool output > 1x1) are not supported.
    assert H == 16 and W == 16, "AvgPool2d(16) implies a 16x16 spatial map"
    K = w2.shape[0]
    HW = H * W

    bchunk = _pick_bchunk(B)
    nchunks = B // bchunk

    x = x_nchw.reshape(B, Cin, HW)                 # pure reshape, no transpose
    wb1 = jnp.concatenate([w1, b1[:, None]], axis=1)   # (Cin, Cin+1)
    wb2 = jnp.concatenate([w2, b2[:, None]], axis=1)   # (K, Cin+1)

    out = pl.pallas_call(
        _attn_key_kernel,
        out_shape=jax.ShapeDtypeStruct((nchunks, K, bchunk), jnp.float32),
        grid_spec=pltpu.PrefetchScalarGridSpec(
            num_scalar_prefetch=0,
            grid=(nchunks,),
            in_specs=[
                pl.BlockSpec((bchunk, Cin, HW), lambda g: (g, 0, 0)),
                # Packed params: constant block index -> fetched once.
                pl.BlockSpec((Cin, Cin + 1), lambda g: (0, 0)),
                pl.BlockSpec((K, Cin + 1), lambda g: (0, 0)),
            ],
            out_specs=pl.BlockSpec((1, K, bchunk), lambda g: (g, 0, 0)),
        ),
        compiler_params=pltpu.CompilerParams(
            dimension_semantics=("parallel",)),
    )(x, wb1, wb2)

    # (nchunks, K, bchunk) -> (B, K, 1, 1)  (matches PyTorch NCHW pool output)
    return out.transpose(0, 2, 1).reshape(B, K, 1, 1)


attention_key_decoder = jax.jit(_forward)


def _reference(x_nchw, w1, b1, w2, b2):
    # Pure-JAX reference of the PyTorch forward (1x1 convs == channel matmuls).
    B, Cin, H, W = x_nchw.shape
    x = x_nchw.reshape(B, Cin, H * W)
    h = jnp.maximum(jnp.einsum("oc,bch->boh", w1, x) + b1[None, :, None], 0.0)
    z = jnp.maximum(jnp.einsum("ko,boh->bkh", w2, h) + b2[None, :, None], 0.0)
    pooled = jnp.mean(z, axis=-1)        # full 16x16 average pool
    return pooled.reshape(B, -1, 1, 1)


if __name__ == "__main__":
    # Shapes consistent with the module: h_dim=32, key_size=16, 16x16 spatial.
    B, h_dim, key_size, H, W = 2, 32, 16, 16, 16

    key = jax.random.PRNGKey(0)
    kx, k1, kb1, k2, kb2 = jax.random.split(key, 5)

    x = jax.random.normal(kx, (B, h_dim, H, W), dtype=jnp.float32)

    # conv weights in PyTorch layout (Cout, Cin) (i.e. weight[:, :, 0, 0]).
    w1 = jax.random.normal(k1, (h_dim, h_dim), dtype=jnp.float32) * 0.1
    b1 = jax.random.normal(kb1, (h_dim,), dtype=jnp.float32) * 0.1
    w2 = jax.random.normal(k2, (key_size, h_dim), dtype=jnp.float32) * 0.1
    b2 = jax.random.normal(kb2, (key_size,), dtype=jnp.float32) * 0.1

    out = attention_key_decoder(x, w1, b1, w2, b2)
    jax.block_until_ready(out)

    ref = _reference(x, w1, b1, w2, b2)
    assert out.shape == (B, key_size, 1, 1), out.shape
    assert jnp.allclose(out, ref, atol=1e-5, rtol=1e-5), "mismatch vs reference"

    print("KERNEL_OK")
</pallas_src>

<mosaic_0001>
module attributes {stable_mosaic.version = 11 : i64} {
  func.func @_attn_key_kernel(%arg0: i32, %arg1: memref<2x32x256xf32, #tpu.memory_space<vmem>>, %arg2: memref<32x33xf32, #tpu.memory_space<vmem>>, %arg3: memref<16x33xf32, #tpu.memory_space<vmem>>, %arg4: memref<1x16x2xf32, #tpu.memory_space<vmem>>) attributes {dimension_semantics = [#tpu.dimension_semantics<parallel>], iteration_bounds = array<i64: 1>, scalar_prefetch = 0 : i64, scratch_operands = 0 : i64, tpu.core_type = #tpu.core_type<tc>, window_params = [{transform_indices = @transform_0, window_bounds = array<i64: 2, 32, 256>}, {pipeline_mode = #tpu.pipeline_mode<synchronous>, transform_indices = @transform_1, window_bounds = array<i64: 32, 33>}, {pipeline_mode = #tpu.pipeline_mode<synchronous>, transform_indices = @transform_2, window_bounds = array<i64: 16, 33>}, {transform_indices = @transform_3, window_bounds = array<i64: 1, 16, 2>}]} {
    %c0 = arith.constant 0 : index
    %c0_0 = arith.constant 0 : index
    %0 = vector.load %arg2[%c0, %c0_0] : memref<32x33xf32, #tpu.memory_space<vmem>>, vector<32x33xf32>
    %c0_1 = arith.constant 0 : index
    %c0_2 = arith.constant 0 : index
    %1 = vector.load %arg3[%c0_1, %c0_2] : memref<16x33xf32, #tpu.memory_space<vmem>>, vector<16x33xf32>
    %2 = vector.extract_strided_slice %0 {offsets = [0, 0], sizes = [32, 32], strides = [1, 1]} : vector<32x33xf32> to vector<32x32xf32>
    %3 = vector.extract_strided_slice %0 {offsets = [0, 32], sizes = [32, 1], strides = [1, 1]} : vector<32x33xf32> to vector<32x1xf32>
    %4 = vector.extract_strided_slice %1 {offsets = [0, 0], sizes = [16, 32], strides = [1, 1]} : vector<16x33xf32> to vector<16x32xf32>
    %5 = vector.extract_strided_slice %1 {offsets = [0, 32], sizes = [16, 1], strides = [1, 1]} : vector<16x33xf32> to vector<16x1xf32>
    %c0_3 = arith.constant 0 : index
    %c0_4 = arith.constant 0 : index
    %c0_5 = arith.constant 0 : index
    %6 = vector.load %arg1[%c0_3, %c0_4, %c0_5] : memref<2x32x256xf32, #tpu.memory_space<vmem>>, vector<1x32x256xf32>
    %7 = vector.shape_cast %6 : vector<1x32x256xf32> to vector<32x256xf32>
    %c1 = arith.constant 1 : index
    %c0_6 = arith.constant 0 : index
    %c0_7 = arith.constant 0 : index
    %8 = vector.load %arg1[%c1, %c0_6, %c0_7] : memref<2x32x256xf32, #tpu.memory_space<vmem>>, vector<1x32x256xf32>
    %9 = vector.shape_cast %8 : vector<1x32x256xf32> to vector<32x256xf32>
    %10 = tpu.concatenate %7, %9 in 1 : vector<32x256xf32>, vector<32x256xf32> -> vector<32x512xf32>
    %cst = arith.constant dense<0.000000e+00> : vector<32x512xf32>
    %11 = tpu.matmul %2, %10, %cst {dimension_numbers = #tpu.dot_dimension_numbers<[1], [0], [0], [1], [0, 0, 1, 1], [], []>} : vector<32x32xf32>, vector<32x512xf32>, vector<32x512xf32> -> vector<32x512xf32>
    %12 = vector.broadcast %3 : vector<32x1xf32> to vector<32x512xf32>
    %13 = arith.addf %11, %12 : vector<32x512xf32>
    %cst_8 = arith.constant 0.000000e+00 : f32
    %14 = vector.broadcast %cst_8 : f32 to vector<32x512xf32>
    %15 = arith.maximumf %13, %14 : vector<32x512xf32>
    %cst_9 = arith.constant dense<0.000000e+00> : vector<16x512xf32>
    %16 = tpu.matmul %4, %15, %cst_9 {dimension_numbers = #tpu.dot_dimension_numbers<[1], [0], [0], [1], [0, 0, 1, 1], [], []>} : vector<16x32xf32>, vector<32x512xf32>, vector<16x512xf32> -> vector<16x512xf32>
    %17 = vector.broadcast %5 : vector<16x1xf32> to vector<16x512xf32>
    %18 = arith.addf %16, %17 : vector<16x512xf32>
    %cst_10 = arith.constant 0.000000e+00 : f32
    %19 = vector.broadcast %cst_10 : f32 to vector<16x512xf32>
    %20 = arith.maximumf %18, %19 : vector<16x512xf32>
    %21 = tpu.iota {dimensions = array<i32: 1>} : vector<2x512xi32>
    %22 = tpu.iota {dimensions = array<i32: 0>} : vector<2x512xi32>
    %c256_i32 = arith.constant 256 : i32
    %23 = vector.broadcast %c256_i32 : i32 to vector<2x512xi32>
    %24 = arith.muli %22, %23 : vector<2x512xi32>
    %25 = arith.cmpi sge, %21, %24 : vector<2x512xi32>
    %c256_i32_11 = arith.constant 256 : i32
    %26 = vector.broadcast %c256_i32_11 : i32 to vector<2x512xi32>
    %27 = arith.addi %24, %26 : vector<2x512xi32>
    %28 = arith.cmpi slt, %21, %27 : vector<2x512xi32>
    %29 = arith.andi %25, %28 : vector<2x512xi1>
    %cst_12 = arith.constant 3.906250e-03 : f32
    %cst_13 = arith.constant 0.000000e+00 : f32
    %30 = vector.broadcast %cst_12 : f32 to vector<2x512xf32>
    %31 = vector.broadcast %cst_13 : f32 to vector<2x512xf32>
    %32 = arith.select %29, %30, %31 : vector<2x512xi1>, vector<2x512xf32>
    %cst_14 = arith.constant dense<0.000000e+00> : vector<16x2xf32>
    %33 = tpu.matmul %20, %32, %cst_14 {dimension_numbers = #tpu.dot_dimension_numbers<[1], [1], [0], [0], [0, 0, 1, 0], [], []>} : vector<16x512xf32>, vector<2x512xf32>, vector<16x2xf32> -> vector<16x2xf32>
    %c0_15 = arith.constant 0 : index
    %c0_16 = arith.constant 0 : index
    %c0_17 = arith.constant 0 : index
    %34 = vector.load %arg4[%c0_15, %c0_16, %c0_17] : memref<1x16x2xf32, #tpu.memory_space<vmem>>, vector<1x16x2xf32>
    %35 = vector.shape_cast %34 : vector<1x16x2xf32> to vector<16x2xf32>
    %36 = vector.shape_cast %33 : vector<16x2xf32> to vector<1x16x2xf32>
    tpu.vector_store %arg4[%c0_15, %c0_16, %c0_17], %36 {strides = array<i32>} : memref<1x16x2xf32, #tpu.memory_space<vmem>>, vector<1x16x2xf32>,
    return
  }
  func.func @transform_0(%arg0: i32) -> (i32, i32, i32) {
    %c0_i32 = arith.constant 0 : i32
    %c0_i32_0 = arith.constant 0 : i32
    %c0_i32_1 = arith.constant 0 : i32
    return %arg0, %c0_i32, %c0_i32_0 : i32, i32, i32
  }
  func.func @transform_1(%arg0: i32) -> (i32, i32) {
    %c0_i32 = arith.constant 0 : i32
    %c0_i32_0 = arith.constant 0 : i32
    %c0_i32_1 = arith.constant 0 : i32
    return %c0_i32, %c0_i32_0 : i32, i32
  }
  func.func @transform_2(%arg0: i32) -> (i32, i32) {
    %c0_i32 = arith.constant 0 : i32
    %c0_i32_0 = arith.constant 0 : i32
    %c0_i32_1 = arith.constant 0 : i32
    return %c0_i32, %c0_i32_0 : i32, i32
  }
  func.func @transform_3(%arg0: i32) -> (i32, i32, i32) {
    %c0_i32 = arith.constant 0 : i32
    %c0_i32_0 = arith.constant 0 : i32
    %c0_i32_1 = arith.constant 0 : i32
    return %arg0, %c0_i32, %c0_i32_0 : i32, i32, i32
  }
}

</mosaic_0001>

<bundles_post_ra>
// kernel: _forward.1
= control target key start
LH: loop header
LB: loop body
LE: loop exit
PB: predicated region body
PF: predicated region fallthrough
CT: control target
= control target key end

     0   :  { %v647_v3 = vmov 0.0   ;;  %vm57_vm0 = vcmask 261120   ;;  %v648_v20 = vmov 32   ;;  %vm611_vm13 = vcmask 15360   ;;  %s776_s0 = inlined_call_operand.vmem [shape: f32[2,32,256], index: 0, kind: input, shape index: {}]   ;;  %s777_s1 = inlined_call_operand.vmem [shape: f32[32,33], index: 1, kind: input, shape index: {}]   ;;  %s778_s2 = inlined_call_operand.vmem [shape: f32[16,33], index: 2, kind: input, shape index: {}]   ;;  %s779_s3 = inlined_call_operand.vmem [shape: f32[1,16,2], index: 3, kind: output, shape index: {}]  }
   0x1   :  { %v27_v0 = vld [vmem:[%s776_s0 + $0x38] sm:$0xff]  ;;  %v26_v2 = vld [vmem:[%s776_s0 + $0x30] sm:$0xff]  ;;  %130 = vmatprep.mubr.f32.mxu0 %v647_v3  ;;  %219 = vmatprep.mubr.f32.mxu1 %v647_v3  ;;  %v25_v5 = vld [vmem:[%s776_s0 + $0x28] sm:$0xff] }
   0x2   :  { %v625_v1 = vld [vmem:[%s776_s0 + $0x78] sm:$0xff]  ;;  %90 = vmatprep.subr.mxu0 %v27_v0  ;;  %v624_v4 = vld [vmem:[%s776_s0 + $0x70] sm:$0xff]  ;;  %v623_v6 = vld [vmem:[%s776_s0 + $0x68] sm:$0xff]  ;;  %646 = vset.pattern.permute.xlu1 %v648_v20 }
   0x3   :  { %179 = vmatprep.subr.mxu1 %v625_v1  ;;  %91 = vmatpush1.msra.mxu0 %v26_v2  ;;  %v24_v7 = vld [vmem:[%s776_s0 + $0x20] sm:$0xff]  ;;  %v23_v9 = vld [vmem:[%s776_s0 + $0x18] sm:$0xff]  ;;  %v22_v11 = vld [vmem:[%s776_s0 + $0x10] sm:$0xff] }
   0x4   :  { %180 = vmatpush1.msra.mxu1 %v624_v4  ;;  %v622_v8 = vld [vmem:[%s776_s0 + $0x60] sm:$0xff]  ;;  %92 = vmatprep.subr.mxu0 %v25_v5  ;;  %v621_v10 = vld [vmem:[%s776_s0 + $0x58] sm:$0xff]  ;;  %v620_v12 = vld [vmem:[%s776_s0 + $0x50] sm:$0xff] }
   0x5   :  { %181 = vmatprep.subr.mxu1 %v623_v6  ;;  %93 = vmatpush1.msra.mxu0 %v24_v7  ;;  %v21_v13 = vld [vmem:[%s776_s0 + $0x8] sm:$0xff]  ;;  %v20_v15 = vld [vmem:[%s776_s0] sm:$0xff]  ;;  %v17_v19 = vld [vmem:[%s777_s1 + $0x18] sm:$0xff] }
   0x6   :  { %182 = vmatpush1.msra.mxu1 %v622_v8  ;;  %v619_v14 = vld [vmem:[%s776_s0 + $0x48] sm:$0xff]  ;;  %94 = vmatprep.subr.mxu0 %v23_v9  ;;  %v618_v16 = vld [vmem:[%s776_s0 + $0x40] sm:$0xff]  ;;  %v16_v21 = vld [vmem:[%s777_s1 + $0x10] sm:$0xff] }
   0x7   :  { %183 = vmatprep.subr.mxu1 %v621_v10  ;;  %95 = vmatpush1.msra.mxu0 %v22_v11  ;;  %v14_v17 = vld [vmem:[%s777_s1] sm:$0xff]  ;;  %v15_v18 = vld [vmem:[%s777_s1 + $0x8] sm:$0xff] }
   0x8   :  { %184 = vmatpush1.msra.mxu1 %v620_v12  ;;  %96 = vmatprep.subr.mxu0 %v21_v13  ;;  %v745_v22 = vld [vmem:[%s778_s2] sm:$0xff]  ;;  %v750_v23 = vld [vmem:[%s778_s2 + $0x8] sm:$0xff]  ;;  %v436_v13 = vlaneseq }
   0x9   :  { %185 = vmatprep.subr.mxu1 %v619_v14  ;;  %97 = vmatpush1.msra.mxu0 %v20_v15 }
   0xa   :  { %186 = vmatpush1.msra.mxu1 %v618_v16  ;;  %626 = vmatmul.mubr.msk.f32.vlgmr.msra.gmra.mxu0 %vm57_vm0, %v14_v17  ;;  %v442_v14 = vshrl.u32 %v436_v13, 7  ;;  %v437_v15 = vand.u32 127, %v436_v13 }
   0xb   :  { %630 = vmatmul.mubr.msk.f32.vlgmr.msra.gmra.mxu1 %vm57_vm0, %v14_v17  ;;  %136 = vmatprep.mubr.f32.mxu0 %v647_v3 }
   0xc   :  { %225 = vmatprep.mubr.f32.mxu1 %v647_v3  ;;  %645 = vset.pattern.permute.xlu0 %v648_v20  ;;  %v443_v16 = vmul.u32 256, %v442_v14  ;;  %v439_v20 = vadd.s32 256, %v437_v15 }
   0xd   :  { %44 = vperm.xlu1 %646, %v15_v18   ;;  %54 = vperm.xlu0 %645, %v17_v19  }
   0xe   :  { %627 = vmatmul.mubr.msk.f32.gmra.mxu0 %vm57_vm0, %v15_v18  ;;  %vm444_vm6 = vcmp.ge.s32.totalorder %v437_v15, %v443_v16  ;;  %vm446_vm8 = vcmp.ge.s32.totalorder %v439_v20, %v443_v16 }
   0xf   :  { %631 = vmatmul.mubr.msk.f32.gmra.mxu1 %vm57_vm0, %v15_v18  ;;  %142 = vmatprep.mubr.f32.mxu0 %v647_v3  ;;  %v448_v18 = vadd.s32 256, %v443_v16 }
  0x10   :  { %231 = vmatprep.mubr.f32.mxu1 %v647_v3 }
  0x11   :  { %39 = vperm.xlu1 %646, %v14_v17   ;;  %49 = vperm.xlu0 %645, %v16_v21   ;;  %v438_v17 = vadd.s32 128, %v437_v15  ;;  %vm449_vm7 = vcmp.lt.s32.totalorder %v437_v15, %v448_v18  ;;  %vm451_vm10 = vcmp.lt.s32.totalorder %v439_v20, %v448_v18 }
  0x12   :  { %628 = vmatmul.mubr.msk.f32.gmra.mxu0 %vm57_vm0, %v16_v21  ;;  %vm453_vm11 = vmand %vm444_vm6, %vm449_vm7 }
  0x13   :  { %632 = vmatmul.mubr.msk.f32.gmra.mxu1 %vm57_vm0, %v16_v21  ;;  %148 = vmatprep.mubr.f32.mxu0 %v647_v3  ;;  %vm445_vm1 = vcmp.ge.s32.totalorder %v438_v17, %v443_v16  ;;  %vm450_vm2 = vcmp.lt.s32.totalorder %v438_v17, %v448_v18  ;;  %vm455_vm12 = vmand %vm446_vm8, %vm451_vm10 }
  0x14   :  { %237 = vmatprep.mubr.f32.mxu1 %v647_v3  ;;  %vm454_vm5 = vmand %vm445_vm1, %vm450_vm2 }
  0x15   :  { %262 = vperm.xlu0 %645, %v745_v22   ;;  %267 = vperm.xlu1 %646, %v750_v23  }
  0x16   :  { %629 = vmatmul.mubr.msk.f32.gmra.mxu0 %vm57_vm0, %v17_v19 }
  0x17   :  { %633 = vmatmul.mubr.msk.f32.gmra.mxu1 %vm57_vm0, %v17_v19  ;;  %338 = vmatprep.mubr.f32.mxu0 %v647_v3  ;;  %v440_v19 = vadd.s32 384, %v437_v15 }
  0x18   :  { %415 = vmatprep.mubr.f32.mxu1 %v647_v3 }
  0x19   :  { %vm447_vm3 = vcmp.ge.s32.totalorder %v440_v19, %v443_v16  ;;  %vm452_vm4 = vcmp.lt.s32.totalorder %v440_v19, %v448_v18 }
  0x1a   :  { %vm456_vm9 = vmand %vm447_vm3, %vm452_vm4 }
  0x88   :  { %v55_v32 = vpop.permute.xlu0 %54  ;;  %v45_v37 = vpop.permute.xlu1 %44 }
  0x8c   :  { %v50_v40 = vpop.permute.xlu0 %49  ;;  %v40_v51 = vpop.permute.xlu1 %39 }
  0xca   :  { %v132_v24 = vpop.f32.mrf.mxu0 }
  0xcb   :  { %v221_v25 = vpop.f32.mrf.mxu1  ;;  %v133_v0 = vadd.f32 %v132_v24, %v40_v51 }
  0xcc   :  { %v134_v26 = vpop.f32.mrf.mxu0  ;;  %v222_v1 = vadd.f32 %v221_v25, %v40_v51 }
  0xcd   :  { %v223_v27 = vpop.f32.mrf.mxu1  ;;  %v135_v60 = vadd.f32 %v134_v26, %v40_v51  ;;  %v244_v11 = vmax.f32 %v133_v0, 0.0 }
  0xce   :  { %v138_v28 = vpop.f32.mrf.mxu0  ;;  %v224_v61 = vadd.f32 %v223_v27, %v40_v51  ;;  %v246_v12 = vmax.f32 %v222_v1, 0.0 }
  0xcf   :  { %v227_v29 = vpop.f32.mrf.mxu1  ;;  %v139_v56 = vadd.f32 %v138_v28, %v45_v37  ;;  %v245_v9 = vmax.f32 %v135_v60, 0.0 }
  0xd0   :  { %v140_v30 = vpop.f32.mrf.mxu0  ;;  %v228_v57 = vadd.f32 %v227_v29, %v45_v37  ;;  %v247_v10 = vmax.f32 %v224_v61, 0.0 }
  0xd1   :  { %v229_v31 = vpop.f32.mrf.mxu1  ;;  %v141_v52 = vadd.f32 %v140_v30, %v45_v37  ;;  %v248_v7 = vmax.f32 %v139_v56, 0.0 }
  0xd2   :  { %v144_v33 = vpop.f32.mrf.mxu0  ;;  %v230_v53 = vadd.f32 %v229_v31, %v45_v37  ;;  %v250_v8 = vmax.f32 %v228_v57, 0.0 }
  0xd3   :  { %v233_v34 = vpop.f32.mrf.mxu1  ;;  %v145_v49 = vadd.f32 %v144_v33, %v50_v40  ;;  %v249_v5 = vmax.f32 %v141_v52, 0.0 }
  0xd4   :  { %v146_v35 = vpop.f32.mrf.mxu0  ;;  %v234_v50 = vadd.f32 %v233_v34, %v50_v40  ;;  %v251_v6 = vmax.f32 %v230_v53, 0.0 }
  0xd5   :  { %v235_v36 = vpop.f32.mrf.mxu1  ;;  %v147_v45 = vadd.f32 %v146_v35, %v50_v40  ;;  %v252_v2 = vmax.f32 %v145_v49, 0.0 }
  0xd6   :  { %v150_v38 = vpop.f32.mrf.mxu0  ;;  %v236_v46 = vadd.f32 %v235_v36, %v50_v40  ;;  %v254_v4 = vmax.f32 %v234_v50, 0.0 }
  0xd7   :  { %v239_v39 = vpop.f32.mrf.mxu1  ;;  %v151_v41 = vadd.f32 %v150_v38, %v55_v32  ;;  %v253_v62 = vmax.f32 %v147_v45, 0.0 }
  0xd8   :  { %v240_v42 = vadd.f32 %v239_v39, %v55_v32  ;;  %v152_v43 = vpop.f32.mrf.mxu0  ;;  %v255_v63 = vmax.f32 %v236_v46, 0.0 }
  0xd9   :  { %v241_v44 = vpop.f32.mrf.mxu1  ;;  %v153_v47 = vadd.f32 %v152_v43, %v55_v32  ;;  %v256_v58 = vmax.f32 %v151_v41, 0.0 }
  0xda   :  { %v242_v48 = vadd.f32 %v241_v44, %v55_v32  ;;  %v258_v59 = vmax.f32 %v240_v42, 0.0  ;;  %v268_v32 = vpop.permute.xlu1 %267 }
  0xdb   :  { %v257_v54 = vmax.f32 %v153_v47, 0.0 }
  0xdc   :  { %v259_v55 = vmax.f32 %v242_v48, 0.0 }
  0xdd   :  { %298 = vmatprep.subr.mxu0 %v257_v54 }
  0xde   :  { %375 = vmatprep.subr.mxu1 %v259_v55  ;;  %299 = vmatpush1.msra.mxu0 %v256_v58 }
  0xdf   :  { %376 = vmatpush1.msra.mxu1 %v258_v59  ;;  %300 = vmatprep.subr.mxu0 %v253_v62 }
  0xe0   :  { %377 = vmatprep.subr.mxu1 %v255_v63  ;;  %301 = vmatpush1.msra.mxu0 %v252_v2 }
  0xe1   :  { %378 = vmatpush1.msra.mxu1 %v254_v4  ;;  %302 = vmatprep.subr.mxu0 %v249_v5 }
  0xe2   :  { %379 = vmatprep.subr.mxu1 %v251_v6  ;;  %303 = vmatpush1.msra.mxu0 %v248_v7 }
  0xe3   :  { %380 = vmatpush1.msra.mxu1 %v250_v8  ;;  %304 = vmatprep.subr.mxu0 %v245_v9 }
  0xe4   :  { %381 = vmatprep.subr.mxu1 %v247_v10  ;;  %305 = vmatpush1.msra.mxu0 %v244_v11 }
  0xe5   :  { %382 = vmatpush1.msra.mxu1 %v246_v12  ;;  %634 = vmatmul.mubr.msk.f32.vlgmr.msra.gmra.mxu0 %vm57_vm0, %v745_v22 }
  0xe6   :  { %636 = vmatmul.mubr.msk.f32.vlgmr.msra.gmra.mxu1 %vm57_vm0, %v745_v22  ;;  %344 = vmatprep.mubr.f32.mxu0 %v647_v3 }
  0xe7   :  { %421 = vmatprep.mubr.f32.mxu1 %v647_v3  ;;  %v649_v3 = vmov 0.00390625  }
  0xe8   :  { %638 = vmatprep.subr.msk.mxu0 %vm454_vm5, %v649_v3  ;;  %640 = vmatprep.subr.msk.mxu1 %vm456_vm9, %v649_v3 }
  0xe9   :  { %635 = vmatmul.mubr.msk.f32.gmra.mxu0 %vm57_vm0, %v750_v23  ;;  %641 = vmatpush1.xpose.msk.msra.mxu1 %vm455_vm12, %v649_v3 }
  0xea   :  { %637 = vmatmul.mubr.msk.f32.gmra.mxu1 %vm57_vm0, %v750_v23  ;;  %639 = vmatpush1.xpose.msk.msra.mxu0 %vm453_vm11, %v649_v3  ;;  %v263_v23 = vpop.permute.xlu0 %262 }
 0x1a5   :  { %v340_v21 = vpop.f32.mrf.mxu0 }
 0x1a6   :  { %v417_v22 = vpop.f32.mrf.mxu1  ;;  %v341_v24 = vadd.f32 %v340_v21, %v263_v23 }
 0x1a7   :  { %v418_v25 = vadd.f32 %v417_v22, %v263_v23  ;;  %v342_v26 = vpop.f32.mrf.mxu0 }
 0x1a8   :  { %v419_v27 = vpop.f32.mrf.mxu1  ;;  %v343_v28 = vadd.f32 %v342_v26, %v263_v23  ;;  %v428_v35 = vmax.f32 %v341_v24, 0.0 }
 0x1a9   :  { %v420_v29 = vadd.f32 %v419_v27, %v263_v23  ;;  %v346_v30 = vpop.f32.mrf.mxu0  ;;  %v430_v36 = vmax.f32 %v418_v25, 0.0 }
 0x1aa   :  { %v423_v31 = vpop.f32.mrf.mxu1  ;;  %v429_v33 = vmax.f32 %v343_v28, 0.0  ;;  %v347_v37 = vadd.f32 %v346_v30, %v268_v32 }
 0x1ab   :  { %v431_v34 = vmax.f32 %v420_v29, 0.0  ;;  %v424_v38 = vadd.f32 %v423_v31, %v268_v32  ;;  %v348_v39 = vpop.f32.mrf.mxu0 }
 0x1ac   :  { %v425_v40 = vpop.f32.mrf.mxu1  ;;  %v349_v41 = vadd.f32 %v348_v39, %v268_v32  ;;  %525 = vmatprep.mubr.f32.mxu0 %v429_v33  ;;  %v432_v45 = vmax.f32 %v347_v37, 0.0 }
 0x1ad   :  { %v426_v42 = vadd.f32 %v425_v40, %v268_v32  ;;  %600 = vmatprep.mubr.f32.mxu1 %v431_v34  ;;  %526 = vmatmul.mubr.f32.vlgmr.msra.gmra.mxu0 %v428_v35  ;;  %v434_v46 = vmax.f32 %v424_v38, 0.0 }
 0x1ae   :  { %601 = vmatmul.mubr.f32.vlgmr.msra.gmra.mxu1 %v430_v36  ;;  %v433_v43 = vmax.f32 %v349_v41, 0.0 }
 0x1af   :  { %v435_v44 = vmax.f32 %v426_v42, 0.0 }
 0x1b0   :  { %530 = vmatprep.mubr.f32.mxu0 %v433_v43 }
 0x1b1   :  { %605 = vmatprep.mubr.f32.mxu1 %v435_v44  ;;  %531 = vmatmul.mubr.f32.gmra.mxu0 %v432_v45 }
 0x1b2   :  { %606 = vmatmul.mubr.f32.gmra.mxu1 %v434_v46 }
 0x26d   :  { %v527_v47 = vpop.f32.mrf.mxu0 }
 0x26e   :  { %v602_v48 = vpop.f32.mrf.mxu1 }
 0x26f   :  { %v603_v49 = vadd.f32 %v602_v48, %v527_v47  ;;  %v529_v50 = vpop.f32.mrf.mxu0 }
 0x270   :  { %v604_v51 = vpop.f32.mrf.mxu1 }
 0x271   :  { %612 = vst.msk [vmem:[%s779_s3] sm:$0xff] %vm611_vm13, %v603_v49  ;;  %v532_v52 = vpop.f32.mrf.mxu0 }
 0x272   :  { %v607_v53 = vpop.f32.mrf.mxu1 }
 0x273   :  { %v608_v54 = vadd.f32 %v607_v53, %v532_v52  ;;  %v534_v55 = vpop.f32.mrf.mxu0 }
 0x274   :  { %v609_v56 = vpop.f32.mrf.mxu1 }
 0x275   :  { %613 = vst.msk [vmem:[%s779_s3 + $0x8] sm:$0xff] %vm611_vm13, %v608_v54 }

</bundles_post_ra>
